<compile_context>
chip_gen: v7x
topology: tpu7x:2x2x1
jax: 0.10.0
libtpu: 0.0.40
codegen_flags: <defaults>
</compile_context>

<pallas_src>
import numpy as np
import jax
import jax.numpy as jnp
from jax import lax
from jax.experimental import pallas as pl
from jax.experimental.pallas import tpu as pltpu


# Model dimensions implied by the module.
C_IN, C_OUT, KH, KW = 16, 16, 3, 3
H, W = 5, 5
OH, OW = H - KH + 1, W - KW + 1          # 3, 3
IN_FEAT = C_IN * H * W                   # 400
CONV_FEAT = C_OUT * OH * OW              # 144
OUT_FEAT = 2


def _fused_kernel(x_ref, w1_ref, w2_ref, o_ref):
    """x:(N,400) f32, w1:(400,144) bf16, w2:(144,2) bf16 -> o:(N,2) f32.

    Both layers run in one program: the conv (expressed as a matmul against a
    tap-scattered weight) and the linear.  The (N,144) conv activation stays
    entirely on-chip.
    """
    x = x_ref[...].astype(jnp.bfloat16)                       # bf16 MXU operands
    feat = jnp.dot(x, w1_ref[...], preferred_element_type=jnp.float32)
    # `feat` == conv output flattened in PyTorch (c, oh, ow) order.
    # TODO(synk): crossbar quantization between the layers would be applied to
    # `feat` here if Conv2d_mvm / Linear_mvm semantics were specified.
    o_ref[...] = jnp.dot(feat.astype(jnp.bfloat16), w2_ref[...],
                         preferred_element_type=jnp.float32)


def prepare_params(conv_w, lin_w):
    """One-time host-side weight prep (numpy, not in the runtime graph).

    Builds w1[(cin,h,w), (cout,oh,ow)] = conv_w[cout,cin,h-oh,w-ow] (0 where the
    tap falls outside the 3x3 window), so that
        x.reshape(N,400) @ w1  ==  conv output already in view(N,-1) order,
    and w2 = lin_w.T.  Eliminates all runtime im2col / transpose glue.
    """
    cw = np.asarray(conv_w, dtype=np.float32)                 # (Cout, Cin, 3, 3)
    lw = np.asarray(lin_w, dtype=np.float32)                  # (2, 144)
    taps = cw.transpose(1, 2, 3, 0)                           # (Cin, kh, kw, Cout)
    w1 = np.zeros((C_IN, H, W, C_OUT, OH, OW), dtype=np.float32)
    for oh in range(OH):
        for ow in range(OW):
            w1[:, oh:oh + KH, ow:ow + KW, :, oh, ow] = taps
    w1 = w1.reshape(IN_FEAT, CONV_FEAT)                       # (400, 144)
    w2 = lw.T                                                 # (144, 2)
    return (jnp.asarray(w1, dtype=jnp.bfloat16),
            jnp.asarray(w2, dtype=jnp.bfloat16))


def my_net_forward(x, w1, w2):
    """x: (N, 16, 5, 5) f32 -> (N, 2) f32, single fused Pallas call."""
    n = x.shape[0]
    x2 = x.reshape(n, IN_FEAT)                                # contiguous NCHW flatten
    flops = 2 * n * IN_FEAT * CONV_FEAT + 2 * n * CONV_FEAT * OUT_FEAT
    bytes_accessed = (x2.size * 4 + int(w1.size) * 2 + int(w2.size) * 2
                      + n * OUT_FEAT * 4)
    # NOTE: no grid on purpose -- everything fits trivially in VMEM on
    # v5e/v6e/v7x and the workload is latency-bound.  If N ever grows large,
    # add a grid over rows (block M a multiple of 8) marked "parallel".
    return pl.pallas_call(
        _fused_kernel,
        out_shape=jax.ShapeDtypeStruct((n, OUT_FEAT), jnp.float32),
        in_specs=[
            pl.BlockSpec(memory_space=pltpu.MemorySpace.VMEM),
            pl.BlockSpec(memory_space=pltpu.MemorySpace.VMEM),
            pl.BlockSpec(memory_space=pltpu.MemorySpace.VMEM),
        ],
        out_specs=pl.BlockSpec(memory_space=pltpu.MemorySpace.VMEM),
        cost_estimate=pl.CostEstimate(flops=flops, transcendentals=0,
                                      bytes_accessed=bytes_accessed),
    )(x2, w1, w2)


if __name__ == "__main__":
    key = jax.random.PRNGKey(0)
    k_conv, k_lin, k_x = jax.random.split(key, 3)

    # Deterministic params matching the PyTorch init:
    #   weights   = rand(16,16,3,3).sub(0.5).mul(0.5)
    #   l_weights = rand(2,144).sub(0.5).mul(0.5)
    conv_w = (jax.random.uniform(k_conv, (C_OUT, C_IN, KH, KW), jnp.float32) - 0.5) * 0.5
    lin_w = (jax.random.uniform(k_lin, (OUT_FEAT, CONV_FEAT), jnp.float32) - 0.5) * 0.5

    # Input: (N, C, H, W) = (2, 16, 5, 5) so that 16*3*3 = 144 after the conv.
    x = jax.random.normal(k_x, (2, C_IN, H, W), jnp.float32)

    w1, w2 = prepare_params(conv_w, lin_w)     # one-time host-side prep

    fwd = jax.jit(my_net_forward)
    out = jax.block_until_ready(fwd(x, w1, w2))

    # Independent pure-JAX f32 reference through lax.conv.
    ref_conv = lax.conv_general_dilated(
        x, conv_w, window_strides=(1, 1), padding="VALID",
        dimension_numbers=("NCHW", "OIHW", "NCHW"),
    )
    ref = ref_conv.reshape(x.shape[0], -1) @ lin_w.T

    assert out.shape == (2, OUT_FEAT)
    # bf16 MXU operands with f32 accumulation -> tolerance loosened vs the f32
    # reference (structural/ordering bugs would produce O(1) errors and still fail).
    assert jnp.allclose(out, ref, atol=1.5e-1, rtol=5e-2), (out, ref)

    print("KERNEL_OK")
</pallas_src>

<mosaic_0001>
module attributes {stable_mosaic.version = 11 : i64} {
  func.func @_fused_kernel(%arg0: memref<2x400xf32, #tpu.memory_space<vmem>>, %arg1: memref<400x144xbf16, #tpu.memory_space<vmem>>, %arg2: memref<144x2xbf16, #tpu.memory_space<vmem>>, %arg3: memref<2x2xf32, #tpu.memory_space<vmem>>) attributes {dimension_semantics = [], scalar_prefetch = 0 : i64, scratch_operands = 0 : i64, tpu.core_type = #tpu.core_type<tc>} {
    %c0 = arith.constant 0 : index
    %c0_0 = arith.constant 0 : index
    %0 = vector.load %arg0[%c0, %c0_0] : memref<2x400xf32, #tpu.memory_space<vmem>>, vector<2x400xf32>
    %1 = arith.truncf %0 : vector<2x400xf32> to vector<2x400xbf16>
    %c0_1 = arith.constant 0 : index
    %c0_2 = arith.constant 0 : index
    %2 = vector.load %arg1[%c0_1, %c0_2] : memref<400x144xbf16, #tpu.memory_space<vmem>>, vector<400x144xbf16>
    %cst = arith.constant dense<0.000000e+00> : vector<2x144xf32>
    %3 = tpu.matmul %1, %2, %cst {dimension_numbers = #tpu.dot_dimension_numbers<[1], [0], [0], [1], [0, 0, 1, 1], [], []>} : vector<2x400xbf16>, vector<400x144xbf16>, vector<2x144xf32> -> vector<2x144xf32>
    %4 = arith.truncf %3 : vector<2x144xf32> to vector<2x144xbf16>
    %c0_3 = arith.constant 0 : index
    %c0_4 = arith.constant 0 : index
    %5 = vector.load %arg2[%c0_3, %c0_4] : memref<144x2xbf16, #tpu.memory_space<vmem>>, vector<144x2xbf16>
    %cst_5 = arith.constant dense<0.000000e+00> : vector<2x2xf32>
    %6 = tpu.matmul %4, %5, %cst_5 {dimension_numbers = #tpu.dot_dimension_numbers<[1], [0], [0], [1], [0, 0, 1, 1], [], []>} : vector<2x144xbf16>, vector<144x2xbf16>, vector<2x2xf32> -> vector<2x2xf32>
    %c0_6 = arith.constant 0 : index
    %c0_7 = arith.constant 0 : index
    %7 = vector.load %arg3[%c0_6, %c0_7] : memref<2x2xf32, #tpu.memory_space<vmem>>, vector<2x2xf32>
    tpu.vector_store %arg3[%c0_6, %c0_7], %6 {strides = array<i32>} : memref<2x2xf32, #tpu.memory_space<vmem>>, vector<2x2xf32>,
    return
  }
}

</mosaic_0001>

<bundles_post_ra>
// kernel: my_net_forward.1
= control target key start
LH: loop header
LB: loop body
LE: loop exit
PB: predicated region body
PF: predicated region fallthrough
CT: control target
= control target key end

     0   :  { %v737_v24 = vmov 1983009808   ;;  %v22_v26 = vlaneseq  ;;  %vm343_vm0 = vcmask 130048   ;;  %s960_s0 = inlined_call_operand.vmem [shape: f32[2,400], index: 0, kind: input, shape index: {}]   ;;  %s961_s1 = inlined_call_operand.vmem [shape: bf16[400,144], index: 1, kind: input, shape index: {}]   ;;  %s962_s2 = inlined_call_operand.vmem [shape: bf16[144,2], index: 2, kind: input, shape index: {}]   ;;  %s963_s3 = inlined_call_operand.hbm [shape: f32[2,2], index: 3, kind: output, shape index: {}]  }
   0x1   :  { %v628_v0 = vld [vmem:[%s961_s1 + $0x4] ss:$8 sps:$4 sm:$0xff]   ;;  %v630_v1 = vld [vmem:[%s961_s1] ss:$8 sps:$4 sm:$0xff]   ;;  %v631_v2 = vld [vmem:[%s961_s1 + $0x14] ss:$8 sps:$4 sm:$0xff]   ;;  %v20_v25 = vunpack.c.l.s4 %v737_v24 }
   0x2   :  { %347 = vmatprep.subr.bf16.mxu0 %v628_v0  ;;  %v633_v3 = vld [vmem:[%s961_s1 + $0x10] ss:$8 sps:$4 sm:$0xff]   ;;  %v634_v4 = vld [vmem:[%s961_s1 + $0x24] ss:$8 sps:$4 sm:$0xff]   ;;  %v636_v5 = vld [vmem:[%s961_s1 + $0x20] ss:$8 sps:$4 sm:$0xff]  }
   0x3   :  { %348 = vmatpush1.bf16.msra.mxu0 %v630_v1  ;;  %v637_v6 = vld [vmem:[%s961_s1 + $0x34] ss:$8 sps:$4 sm:$0xff]   ;;  %v649_v7 = vld [vmem:[%s961_s1 + $0x104] ss:$8 sps:$4 sm:$0xff]   ;;  %v651_v8 = vld [vmem:[%s961_s1 + $0x100] ss:$8 sps:$4 sm:$0xff]   ;;  %v21_v31 = vunpack.c.0.s8 %v20_v25 }
   0x4   :  { %349 = vmatprep.subr.bf16.mxu0 %v631_v2  ;;  %v639_v9 = vld [vmem:[%s961_s1 + $0x30] ss:$8 sps:$4 sm:$0xff]   ;;  %v640_v10 = vld [vmem:[%s961_s1 + $0x44] ss:$8 sps:$4 sm:$0xff]   ;;  %388 = vmatprep.subr.bf16.mxu1 %v649_v7  ;;  %v655_v11 = vld [vmem:[%s961_s1 + $0x114] ss:$8 sps:$4 sm:$0xff]  }
   0x5   :  { %389 = vmatpush1.bf16.msra.mxu1 %v651_v8  ;;  %v657_v12 = vld [vmem:[%s961_s1 + $0x110] ss:$8 sps:$4 sm:$0xff]   ;;  %v642_v13 = vld [vmem:[%s961_s1 + $0x40] ss:$8 sps:$4 sm:$0xff]   ;;  %v661_v14 = vld [vmem:[%s961_s1 + $0x124] ss:$8 sps:$4 sm:$0xff]  }
   0x6   :  { %390 = vmatprep.subr.bf16.mxu1 %v655_v11  ;;  %v643_v15 = vld [vmem:[%s961_s1 + $0x54] ss:$8 sps:$4 sm:$0xff]   ;;  %v663_v16 = vld [vmem:[%s961_s1 + $0x120] ss:$8 sps:$4 sm:$0xff]   ;;  %v645_v18 = vld [vmem:[%s961_s1 + $0x50] ss:$8 sps:$4 sm:$0xff]  }
   0x7   :  { %350 = vmatpush1.bf16.msra.mxu0 %v633_v3  ;;  %v667_v17 = vld [vmem:[%s961_s1 + $0x134] ss:$8 sps:$4 sm:$0xff]   ;;  %v646_v19 = vld [vmem:[%s961_s1 + $0x64] ss:$8 sps:$4 sm:$0xff]   ;;  %v669_v20 = vld [vmem:[%s961_s1 + $0x130] ss:$8 sps:$4 sm:$0xff]  }
   0x8   :  { %351 = vmatprep.subr.bf16.mxu0 %v634_v4  ;;  %v673_v21 = vld [vmem:[%s961_s1 + $0x144] ss:$8 sps:$4 sm:$0xff]   ;;  %v648_v22 = vld [vmem:[%s961_s1 + $0x60] ss:$8 sps:$4 sm:$0xff]   ;;  %v652_v23 = vld [vmem:[%s961_s1 + $0x74] ss:$8 sps:$4 sm:$0xff]  }
   0x9   :  { %391 = vmatpush1.bf16.msra.mxu1 %v657_v12  ;;  %v675_v27 = vld [vmem:[%s961_s1 + $0x140] ss:$8 sps:$4 sm:$0xff]   ;;  %v679_v28 = vld [vmem:[%s961_s1 + $0x154] ss:$8 sps:$4 sm:$0xff]   ;;  %v654_v29 = vld [vmem:[%s961_s1 + $0x70] ss:$8 sps:$4 sm:$0xff]  }
   0xa   :  { %392 = vmatprep.subr.bf16.mxu1 %v661_v14  ;;  %v658_v30 = vld [vmem:[%s961_s1 + $0x84] ss:$8 sps:$4 sm:$0xff]   ;;  %v23_v32 = vshrl.u32 %v22_v26, 7  ;;  %v681_v33 = vld [vmem:[%s961_s1 + $0x150] ss:$8 sps:$4 sm:$0xff]  }
   0xb   :  { %352 = vmatpush1.bf16.msra.mxu0 %v636_v5  ;;  %v685_v34 = vld [vmem:[%s961_s1 + $0x164] ss:$8 sps:$4 sm:$0xff]   ;;  %v660_v35 = vld [vmem:[%s961_s1 + $0x80] ss:$8 sps:$4 sm:$0xff]   ;;  %v664_v36 = vld [vmem:[%s961_s1 + $0x94] ss:$8 sps:$4 sm:$0xff]  }
   0xc   :  { %353 = vmatprep.subr.bf16.mxu0 %v637_v6  ;;  %v24_v37 = vsub.s32 %v21_v31, %v23_v32  ;;  %v687_v38 = vld [vmem:[%s961_s1 + $0x160] ss:$8 sps:$4 sm:$0xff]   ;;  %v691_v40 = vld [vmem:[%s961_s1 + $0x174] ss:$8 sps:$4 sm:$0xff]   ;;  %v666_v43 = vld [vmem:[%s961_s1 + $0x90] ss:$8 sps:$4 sm:$0xff]  }
   0xd   :  { %393 = vmatpush1.bf16.msra.mxu1 %v663_v16  ;;  %v16_v39 = vld [vmem:[%s960_s0] sm:$0xff]  ;;  %v693_v48 = vld [vmem:[%s961_s1 + $0x170] ss:$8 sps:$4 sm:$0xff]   ;;  %v676_v52 = vld [vmem:[%s961_s1 + $0xb4] ss:$8 sps:$4 sm:$0xff]  }
   0xe   :  { %394 = vmatprep.subr.bf16.mxu1 %v667_v17  ;;  %v18_v41 = vcombine.high %v16_v39, %v16_v39  ;;  %v865_v42 = vrot.slane %v16_v39, %v24_v37  ;;  %v670_v44 = vld [vmem:[%s961_s1 + $0xa4] ss:$8 sps:$4 sm:$0xff]   ;;  %v672_v47 = vld [vmem:[%s961_s1 + $0xa0] ss:$8 sps:$4 sm:$0xff]  }
   0xf   :  { %354 = vmatpush1.bf16.msra.mxu0 %v639_v9  ;;  %v697_v49 = vld [vmem:[%s961_s1 + $0x184] ss:$8 sps:$4 sm:$0xff]   ;;  %v699_v53 = vld [vmem:[%s961_s1 + $0x180] ss:$8 sps:$4 sm:$0xff]  }
  0x10   :  { %355 = vmatprep.subr.bf16.mxu0 %v640_v10  ;;  %v32_v45 = vrot.slane %v18_v41, %v24_v37  ;;  %v33_v46 = vcombine.high %v865_v42, %v865_v42 }
  0x11   :  { %395 = vmatpush1.bf16.msra.mxu1 %v669_v20 }
  0x12   :  { %396 = vmatprep.subr.bf16.mxu1 %v673_v21  ;;  %v34_v50 = vcombine.high %v32_v45, %v32_v45  ;;  %v40_v51 = vpack.c.bf16 %v33_v46, %v33_v46 }
  0x13   :  { %356 = vmatpush1.bf16.msra.mxu0 %v642_v13 }
  0x14   :  { %357 = vmatprep.subr.bf16.mxu0 %v643_v15  ;;  %v42_v54 = vpack.c.bf16 %v34_v50, %v34_v50  ;;  %379 = vmatprep.mubr.bf16.mxu0 %v40_v51 }
  0x15   :  { %397 = vmatpush1.bf16.msra.mxu1 %v675_v27 }
  0x16   :  { %398 = vmatprep.subr.bf16.mxu1 %v679_v28  ;;  %612 = vmatprep.mubr.msk.bf16.mxu1 %vm343_vm0, %v42_v54 }
  0x17   :  { %358 = vmatpush1.bf16.msra.mxu0 %v645_v18 }
  0x18   :  { %359 = vmatprep.subr.bf16.mxu0 %v646_v19 }
  0x19   :  { %399 = vmatpush1.bf16.msra.mxu1 %v681_v33 }
  0x1a   :  { %400 = vmatprep.subr.bf16.mxu1 %v685_v34 }
  0x1b   :  { %360 = vmatpush1.bf16.msra.mxu0 %v648_v22 }
  0x1c   :  { %361 = vmatprep.subr.bf16.mxu0 %v652_v23 }
  0x1d   :  { %401 = vmatpush1.bf16.msra.mxu1 %v687_v38 }
  0x1e   :  { %402 = vmatprep.subr.bf16.mxu1 %v691_v40 }
  0x1f   :  { %362 = vmatpush1.bf16.msra.mxu0 %v654_v29 }
  0x20   :  { %363 = vmatprep.subr.bf16.mxu0 %v658_v30 }
  0x21   :  { %403 = vmatpush1.bf16.msra.mxu1 %v693_v48 }
  0x22   :  { %404 = vmatprep.subr.bf16.mxu1 %v697_v49 }
  0x23   :  { %364 = vmatpush1.bf16.msra.mxu0 %v660_v35 }
  0x24   :  { %365 = vmatprep.subr.bf16.mxu0 %v664_v36 }
  0x27   :  { %366 = vmatpush1.bf16.msra.mxu0 %v666_v43 }
  0x28   :  { %367 = vmatprep.subr.bf16.mxu0 %v670_v44 }
  0x29   :  { %8 = vsyncpa [#allocation3], 0  ;;  %v678_v55 = vld [vmem:[%s961_s1 + $0xb0] ss:$8 sps:$4 sm:$0xff]   ;;  %v682_v56 = vld [vmem:[%s961_s1 + $0xc4] ss:$8 sps:$4 sm:$0xff]   ;;  %v41_v57 = vpack.c.bf16 %v32_v45, %v32_v45  ;;  %405 = vmatpush1.bf16.msra.mxu1 %v699_v53  ;;  %v39_v7 = vpack.c.bf16 %v865_v42, %v865_v42 }
  0x2a   :  { %v704_v58 = vld [vmem:[%s962_s2] sm:$0xff]   ;;  %v738_v59 = vmov 0   ;;  %v688_v61 = vld [vmem:[%s961_s1 + $0xd4] ss:$8 sps:$4 sm:$0xff]   ;;  %v705_v62 = vld [vmem:[%s962_s2 + $0x8] sm:$0xff]   ;;  %s739_s21 = smov [#allocation2]  }
  0x2b   :  { %368 = vmatpush1.bf16.msra.mxu0 %v672_v47  ;;  %506 = vmatprep.subr.bf16.mxu1 %v738_v59  ;;  %v684_v60 = vld [vmem:[%s961_s1 + $0xc0] ss:$8 sps:$4 sm:$0xff]   ;;  %v690_v63 = vld [vmem:[%s961_s1 + $0xd0] ss:$8 sps:$4 sm:$0xff]   ;;  %v694_v0 = vld [vmem:[%s961_s1 + $0xe4] ss:$8 sps:$4 sm:$0xff]  }
  0x2c   :  { %369 = vmatprep.subr.bf16.mxu0 %v676_v52  ;;  %421 = vmatmul.mubr.bf16.vlgmr.msra.gmra.mrb[0].mxu1 %v41_v57  ;;  %v706_v1 = vld [vmem:[%s962_s2 + $0x10] sm:$0xff]   ;;  %v696_v2 = vld [vmem:[%s961_s1 + $0xe0] ss:$8 sps:$4 sm:$0xff]   ;;  %v707_v4 = vld [vmem:[%s962_s2 + $0x18] sm:$0xff]   ;;  %s554_s22 = sshll.u32 %s739_s21, 4  ;;  %vm546_vm1 = vcmask 9216   ;;  %s555_s22 = int_to_ptr.vmem [resolvable:$true] %s554_s22 }
  0x2d   :  { %507 = vmatpush1.bf16.msra.mxu1 %v704_v58  ;;  %v700_v3 = vld [vmem:[%s961_s1 + $0xf4] ss:$8 sps:$4 sm:$0xff]   ;;  %v703_v5 = vld [vmem:[%s961_s1 + $0xf0] ss:$8 sps:$4 sm:$0xff]   ;;  %v708_v6 = vld [vmem:[%s962_s2 + $0x20] sm:$0xff]   ;;  %p718_p1 = scmp.lt.s32.totalorder %s555_s22, %s555_s22 }
  0x2e   :  { %508 = vmatprep.subr.bf16.mxu1 %v738_v59  ;;  %v709_v8 = vld [vmem:[%s962_s2 + $0x28] sm:$0xff]   ;;  %v710_v9 = vld [vmem:[%s962_s2 + $0x30] sm:$0xff]   ;;  %v711_v10 = vld [vmem:[%s962_s2 + $0x38] sm:$0xff]  }
  0x2f   :  { %370 = vmatpush1.bf16.msra.mxu0 %v678_v55  ;;  %v712_v11 = vld [vmem:[%s962_s2 + $0x40] sm:$0xff]   ;;  %s713_s2 = scalar_lea.vmem %s555_s22, 32 }
  0x30   :  { %371 = vmatprep.subr.bf16.mxu0 %v682_v56  ;;  %p714_p0 = scmp.ne.s32.totalorder %s555_s22, %s713_s2  ;;  %p719_p2 = scmp.lt.s32.totalorder %s713_s2, %s713_s2 }
  0x31   :  { %509 = vmatpush1.bf16.msra.mxu1 %v705_v62 }
  0x32   :  { %510 = vmatprep.subr.bf16.mxu1 %v738_v59  ;;  %p720_p3 = por %p719_p2, %p718_p1 }
  0x33   :  { %372 = vmatpush1.bf16.msra.mxu0 %v684_v60 }
  0x34   :  { %373 = vmatprep.subr.bf16.mxu0 %v688_v61  ;;  %p721_p4 = pnand %p720_p3, %p714_p0 }
  0x35   :  { %511 = vmatpush1.bf16.msra.mxu1 %v706_v1 }
  0x36   :  { %512 = vmatprep.subr.bf16.mxu1 %v738_v59 }
  0x37   :  { %374 = vmatpush1.bf16.msra.mxu0 %v690_v63 }
  0x38   :  { %375 = vmatprep.subr.bf16.mxu0 %v694_v0 }
  0x39   :  { %513 = vmatpush1.bf16.msra.mxu1 %v707_v4 }
  0x3a   :  { %514 = vmatprep.subr.bf16.mxu1 %v738_v59 }
  0x3b   :  { %376 = vmatpush1.bf16.msra.mxu0 %v696_v2 }
  0x3c   :  { %377 = vmatprep.subr.bf16.mxu0 %v700_v3 }
  0x3d   :  { %515 = vmatpush1.bf16.msra.mxu1 %v708_v6 }
  0x3e   :  { %516 = vmatprep.subr.bf16.mxu1 %v738_v59 }
  0x3f   :  { %378 = vmatpush1.bf16.msra.mxu0 %v703_v5 }
  0x41   :  { %517 = vmatpush1.bf16.msra.mxu1 %v709_v8 }
  0x42   :  { %380 = vmatmul.mubr.bf16.vlgmr.msra.gmra.mrb[0].mxu0 %v39_v7  ;;  %518 = vmatprep.subr.bf16.mxu1 %v738_v59 }
  0x45   :  { %519 = vmatpush1.bf16.msra.mxu1 %v710_v9 }
  0x46   :  { %520 = vmatprep.subr.bf16.mxu1 %v738_v59 }
  0x49   :  { %521 = vmatpush1.bf16.msra.mxu1 %v711_v10 }
  0x4a   :  { %522 = vmatprep.subr.bf16.mxu1 %v738_v59 }
  0x4d   :  { %523 = vmatpush1.bf16.msra.mxu1 %v712_v11 }
  0xff   :  { %v422_v12 = vpop.f32.mrb[0].mxu1 }
 0x100   :  { %v424_v13 = vpop.f32.mrb[1].mxu1 }
 0x101   :  { %v426_v14 = vpop.f32.mrb[2].mxu1 }
 0x102   :  { %v427_v15 = vpop.f32.mrb[3].mxu1 }
 0x115   :  { %v381_v16 = vpop.f32.mrb[0].mxu0 }
 0x116   :  { %v423_v17 = vadd.f32 %v422_v12, %v381_v16  ;;  %v383_v18 = vpop.f32.mrb[1].mxu0 }
 0x117   :  { %v425_v19 = vadd.f32 %v424_v13, %v383_v18  ;;  %v385_v20 = vpop.f32.mrb[2].mxu0 }
 0x118   :  { %v386_v21 = vpop.f32.mrb[3].mxu0  ;;  %v429_v23 = vpack.c.bf16 %v423_v17, %v423_v17 }
 0x119   :  { %v430_v22 = vpack.c.bf16 %v425_v19, %v425_v19 }
 0x11b   :  { %622 = vmatprep.mubr.msk.bf16.mxu1 %vm343_vm0, %v430_v22 }
 0x11c   :  { %539 = vmatmul.mubr.bf16.vlgmr.msra.gmra.mrb[4].mxu1 %v429_v23 }
 0x1ef   :  { %v540_v24 = vpop.f32.mrb[4].mxu1 }
 0x1f0   :  { %547 = vst.msk [vmem:[#allocation2] sm:$0x3] %vm546_vm1, %v540_v24  ;;  %v542_v25 = vpop.f32.mrb[5].mxu1 }
 0x1f1   :  { %v543_v26 = vpop.f32.mrb[6].mxu1 }
 0x1f2   :  { %724 = shalt.err (!%p721_p4)
}
 0x1f3   :  { %s725_s25 = scalar_lea.hbm %s963_s3, 32 }
 0x1f4   :  { %p726_p5 = scmp.ne.s32.totalorder %s963_s3, %s725_s25  ;;  %p729_p6 = scmp.lt.u32.totalorder %s725_s25, %s963_s3 }
 0x1f6   :  { %p731_p7 = pnand %p729_p6, %p726_p5 }
 0x1f8   :  { %734 = shalt.err (!%p731_p7)
}
 0x1f9   :  { %557 = dma.vmem_to_hbm [thread:$0]  %s555_s22, 32, %s963_s3, [#allocation3]   ;;  %v544_v27 = vpop.f32.mrb[7].mxu1 }
 0x1fa   :  { %735 = dma.done.wait [#allocation3], 32  }
 0x1fb   :  { %736 = vsyncadd [#allocation3], 4294967264 }
 0x1fc   :  { %561 = vsyncpa [#allocation3], 1 }

</bundles_post_ra>
